<compile_context>
chip_gen: v5e
topology: v5e:2x2
jax: 0.10.0
libtpu: 0.0.40
codegen_flags: <defaults>
</compile_context>

<pallas_src>
import functools

import jax
import jax.numpy as jnp
from jax.experimental import pallas as pl
from jax.experimental.pallas import tpu as pltpu


def _round_up(v, mult):
    return -(-v // mult) * mult


def _index_kernel(p_ref, w_ref, o_ref):
    """One M-tile of the hot path.

    p_ref: (K, TM)  2x2 patches           (K = C*2*2, TM lane-dense, multiple of 128)
    w_ref: (8, K)   conv weight duplicated along sublanes (rows 0-3 == rows 4-7)
    o_ref: (8, TM)  rows 0-3 = softmax(sigmoid(logits)) over channels,
                    rows 4-7 = sigmoid(logits)
    """
    logits = jnp.dot(w_ref[...], p_ref[...],
                     preferred_element_type=jnp.float32)          # (8, TM)
    y = jax.nn.sigmoid(logits)                                    # rows 0-3 == rows 4-7
    # y is in (0,1) so exp cannot overflow: no max-subtraction needed.
    e = jnp.exp(y)
    # Full 8-sublane reduce; rows are duplicated, so halve the sum.
    denom = 0.5 * jnp.sum(e, axis=0, keepdims=True)               # (1, TM)
    z = e / denom                                                  # exact softmax
    row = jax.lax.broadcasted_iota(jnp.int32, logits.shape, 0)
    # Single full (8, TM) unmasked store: softmax in rows 0-3, sigmoid in rows 4-7.
    o_ref[...] = jnp.where(row < 4, z, y).astype(o_ref.dtype)


def _pixel_shuffle_from_4m(v4m, n, ho, wo):
    # v4m: (4, M) with channel k = ry*2 + rx and M indexing (n, h', w') row-major.
    v = v4m.reshape(2, 2, n, ho, wo)                 # (ry, rx, n, h', w')
    v = jnp.transpose(v, (2, 3, 0, 4, 1))            # (n, h', ry, w', rx)
    return v.reshape(n, 1, ho * 2, wo * 2)           # NCHW, C=1


@functools.partial(jax.jit, static_argnames=("tile_m",))
def holistic_index_block(x, weight, tile_m=8192):
    """x: (N, C, H, W) float32; weight: (4, C, 2, 2) float32 (conv OIHW)."""
    n, c, h, w = x.shape
    ho, wo = h // 2, w // 2
    k = c * 2 * 2
    m = n * ho * wo

    # --- glue: non-overlapping 2x2 patches with a SINGLE transpose.
    # K flattens (c, kh, kw) -- matches OIHW weight flattening; M flattens (n, h', w').
    xp = x.reshape(n, c, ho, 2, wo, 2)
    patches_t = jnp.transpose(xp, (1, 3, 5, 0, 2, 4)).reshape(k, m)    # (K, M)
    w8 = jnp.tile(weight.reshape(4, k), (2, 1))                        # (8, K)

    # --- tiling: big lane-dense tiles (the kernel is HBM / step-overhead bound).
    m_lanes = _round_up(m, 128)
    tile_eff = min(_round_up(max(tile_m, 128), 128), m_lanes)
    # Keep >= 2 grid steps when there is enough work so v7x's two TensorCores both
    # get a share of the ("parallel",) grid axis; no-op for tiny problems.
    if m_lanes >= 256:
        tile_eff = min(tile_eff, _round_up(-(-m // 2), 128))
    # VMEM budget: (K in + 8 out) lanes * 4 B, double-buffered; stay well under the
    # 32 MiB scoped default (and v7x's 64 MiB physical VMEM).
    per_lane_bytes = (k + 8) * 4 * 2
    max_lanes = max(128, ((16 * 1024 * 1024) // per_lane_bytes) // 128 * 128)
    tile_eff = min(tile_eff, max_lanes)
    grid_n = pl.cdiv(m, tile_eff)

    out = pl.pallas_call(
        _index_kernel,
        out_shape=jax.ShapeDtypeStruct((8, m), jnp.float32),
        grid=(grid_n,),
        in_specs=[
            pl.BlockSpec((k, tile_eff), lambda i: (0, i)),
            pl.BlockSpec((8, k), lambda i: (0, 0)),
        ],
        out_specs=pl.BlockSpec((8, tile_eff), lambda i: (0, i)),
        compiler_params=pltpu.CompilerParams(
            dimension_semantics=("parallel",),
            allow_input_fusion=[True, True],
            vmem_limit_bytes=32 * 1024 * 1024,
        ),
    )(patches_t, w8)

    z4m = out[0:4, :]
    y4m = out[4:8, :]

    # --- glue: pixel_shuffle(·, 2) as reshape/transpose (layout only).
    idx_en = _pixel_shuffle_from_4m(z4m, n, ho, wo)
    idx_de = _pixel_shuffle_from_4m(y4m, n, ho, wo)
    return idx_en, idx_de


def _reference(x, weight):
    """Pure-JAX reference mirroring the PyTorch forward."""
    conv = jax.lax.conv_general_dilated(
        x, weight, window_strides=(2, 2), padding="VALID",
        dimension_numbers=("NCHW", "OIHW", "NCHW"))
    y = jax.nn.sigmoid(conv)
    z = jax.nn.softmax(y, axis=1)

    def pixel_shuffle(v):
        nb, c4, ho, wo = v.shape
        v = v.reshape(nb, 1, 2, 2, ho, wo)
        v = jnp.transpose(v, (0, 1, 4, 2, 5, 3))
        return v.reshape(nb, 1, ho * 2, wo * 2)

    return pixel_shuffle(z), pixel_shuffle(y)


if __name__ == "__main__":
    key = jax.random.PRNGKey(0)
    kx, kw = jax.random.split(key)

    # Shape 1: the small canonical test shape (single tile, M exactly 128).
    N, C, H, W = 2, 4, 16, 16
    x = jax.random.normal(kx, (N, C, H, W), dtype=jnp.float32)
    weight = jax.random.normal(kw, (4, C, 2, 2), dtype=jnp.float32) * 0.1

    idx_en, idx_de = holistic_index_block(x, weight)
    jax.block_until_ready((idx_en, idx_de))

    ref_en, ref_de = _reference(x, weight)
    assert idx_en.shape == (N, 1, H, W) and idx_de.shape == (N, 1, H, W)
    assert jnp.allclose(idx_de, ref_de, atol=1e-4, rtol=1e-4)
    assert jnp.allclose(idx_en, ref_en, atol=1e-4, rtol=1e-4)

    # Shape 2: exercises a grid of length 2 AND the partial-last-block path
    # (m = 2*18*20 = 720 -> tile 384, 2 grid steps, last block 336/384 valid).
    N2, C2, H2, W2 = 2, 4, 36, 40
    x2 = jax.random.normal(kx, (N2, C2, H2, W2), dtype=jnp.float32)
    w2 = jax.random.normal(kw, (4, C2, 2, 2), dtype=jnp.float32) * 0.1

    en2, de2 = holistic_index_block(x2, w2)
    jax.block_until_ready((en2, de2))

    r_en2, r_de2 = _reference(x2, w2)
    assert en2.shape == (N2, 1, H2, W2) and de2.shape == (N2, 1, H2, W2)
    assert jnp.allclose(de2, r_de2, atol=1e-4, rtol=1e-4)
    assert jnp.allclose(en2, r_en2, atol=1e-4, rtol=1e-4)

    print("KERNEL_OK")
</pallas_src>

<mosaic_0001>
module attributes {stable_mosaic.version = 11 : i64} {
  func.func @_index_kernel(%arg0: i32, %arg1: memref<16x128xf32, #tpu.memory_space<vmem>>, %arg2: memref<8x16xf32, #tpu.memory_space<vmem>>, %arg3: memref<8x128xf32, #tpu.memory_space<vmem>>) attributes {dimension_semantics = [#tpu.dimension_semantics<parallel>], iteration_bounds = array<i64: 1>, scalar_prefetch = 0 : i64, scratch_operands = 0 : i64, tpu.core_type = #tpu.core_type<tc>, window_params = [{transform_indices = @transform_0, window_bounds = array<i64: 16, 128>}, {pipeline_mode = #tpu.pipeline_mode<synchronous>, transform_indices = @transform_1, window_bounds = array<i64: 8, 16>}, {transform_indices = @transform_2, window_bounds = array<i64: 8, 128>}]} {
    %c0 = arith.constant 0 : index
    %c0_0 = arith.constant 0 : index
    %0 = vector.load %arg2[%c0, %c0_0] : memref<8x16xf32, #tpu.memory_space<vmem>>, vector<8x16xf32>
    %c0_1 = arith.constant 0 : index
    %c0_2 = arith.constant 0 : index
    %1 = vector.load %arg1[%c0_1, %c0_2] : memref<16x128xf32, #tpu.memory_space<vmem>>, vector<16x128xf32>
    %cst = arith.constant dense<0.000000e+00> : vector<8x128xf32>
    %2 = tpu.matmul %0, %1, %cst {dimension_numbers = #tpu.dot_dimension_numbers<[1], [0], [0], [1], [0, 0, 1, 1], [], []>} : vector<8x16xf32>, vector<16x128xf32>, vector<8x128xf32> -> vector<8x128xf32>
    %3 = arith.negf %2 : vector<8x128xf32>
    %4 = math.exp %3 : vector<8x128xf32>
    %cst_3 = arith.constant 1.000000e+00 : f32
    %5 = vector.broadcast %cst_3 : f32 to vector<8x128xf32>
    %6 = arith.addf %5, %4 : vector<8x128xf32>
    %7 = arith.divf %5, %6 : vector<8x128xf32>
    %8 = math.exp %7 : vector<8x128xf32>
    %cst_4 = arith.constant dense<0.000000e+00> : vector<128xf32>
    %9 = vector.multi_reduction <add>, %8, %cst_4 [0] : vector<8x128xf32> to vector<128xf32>
    %10 = vector.shape_cast %9 : vector<128xf32> to vector<1x128xf32>
    %cst_5 = arith.constant 5.000000e-01 : f32
    %11 = vector.broadcast %cst_5 : f32 to vector<1x128xf32>
    %12 = arith.mulf %11, %10 : vector<1x128xf32>
    %13 = vector.broadcast %12 : vector<1x128xf32> to vector<8x128xf32>
    %14 = arith.divf %8, %13 : vector<8x128xf32>
    %15 = tpu.iota {dimensions = array<i32: 0>} : vector<8x128xi32>
    %c4_i32 = arith.constant 4 : i32
    %16 = vector.broadcast %c4_i32 : i32 to vector<8x128xi32>
    %17 = arith.cmpi slt, %15, %16 : vector<8x128xi32>
    %18 = arith.select %17, %14, %7 : vector<8x128xi1>, vector<8x128xf32>
    %c0_6 = arith.constant 0 : index
    %c0_7 = arith.constant 0 : index
    %19 = vector.load %arg3[%c0_6, %c0_7] : memref<8x128xf32, #tpu.memory_space<vmem>>, vector<8x128xf32>
    tpu.vector_store %arg3[%c0_6, %c0_7], %18 {strides = array<i32>} : memref<8x128xf32, #tpu.memory_space<vmem>>, vector<8x128xf32>,
    return
  }
  func.func @transform_0(%arg0: i32) -> (i32, i32) {
    %c0_i32 = arith.constant 0 : i32
    %c0_i32_0 = arith.constant 0 : i32
    return %c0_i32, %arg0 : i32, i32
  }
  func.func @transform_1(%arg0: i32) -> (i32, i32) {
    %c0_i32 = arith.constant 0 : i32
    %c0_i32_0 = arith.constant 0 : i32
    %c0_i32_1 = arith.constant 0 : i32
    return %c0_i32, %c0_i32_0 : i32, i32
  }
  func.func @transform_2(%arg0: i32) -> (i32, i32) {
    %c0_i32 = arith.constant 0 : i32
    %c0_i32_0 = arith.constant 0 : i32
    return %c0_i32, %arg0 : i32, i32
  }
}

</mosaic_0001>

<bundles_post_ra>
// kernel: holistic_index_block.1
= control target key start
LH: loop header
LB: loop body
LE: loop exit
PB: predicated region body
PF: predicated region fallthrough
CT: control target
= control target key end

     0   :  { %vm14_vm0 = vcmask 130048   ;;  %v81_v28 = vlaneseq  ;;  %s127_s0 = inlined_call_operand.vmem [shape: f32[16,128], index: 0, kind: input, shape index: {}]   ;;  %s128_s1 = inlined_call_operand.vmem [shape: f32[8,16], index: 1, kind: input, shape index: {}]   ;;  %s129_s2 = inlined_call_operand.vmem [shape: f32[8,128], index: 2, kind: output, shape index: {}]  }
   0x1   :  { %v13_v0 = vld [vmem:[%s127_s0 + $0x8] sm:$0xff]  ;;  %v12_v1 = vld [vmem:[%s127_s0] sm:$0xff] }
   0x2   :  { %32 = vmatpush.msra.mxu0 %v13_v0  ;;  %v11_v2 = vld [vmem:[%s128_s1] sm:$0xff]  ;;  %v82_v33 = vshrl.u32 %v81_v28, 7 }
   0x4   :  { %33 = vmatpush.msra.mxu0 %v12_v1  ;;  %vm83_vm9 = vcmp.lt.s32.totalorder %v82_v33, 4 }
   0x5   :  { %90 = vmatmul.msk.f32.vlgmr.msra.gmra.mxu0 %vm14_vm0, %v11_v2 }
  0x82   :  { %v35_v3 = vpop.f32.mrf.mxu0 }
  0x83   :  { %v91_v4 = vmul.f32 -1.442695, %v35_v3 }
  0x85   :  { %92 = vpow2.f32 %v91_v4 }
  0x8b   :  { %v93_v5 = vpop.eup %92 }
  0x8c   :  { %v41_v6 = vadd.f32 1.0, %v93_v5 }
  0x8e   :  { %94 = vrcp.f32 %v41_v6  ;;  %v53_v10 = vand.u32 2147483648, %v41_v6  ;;  %v51_v12 = vand.u32 2147483647, %v41_v6  ;;  %vm47_vm2 = vweird.f32 %v41_v6 }
  0x90   :  { %v54_v14 = vor.u32 1.1754944e-38, %v53_v10  ;;  %vm52_vm4 = vcmp.eq.f32.partialorder %v51_v12, 8.507059e+37 }
  0x94   :  { %v95_v7 = vpop.eup %94 }
  0x95   :  { %v43_v8 = vmul.f32 %v95_v7, %v41_v6  ;;  %vm48_vm1 = vweird.f32 %v95_v7 }
  0x96   :  { %vm49_vm3 = vmor %vm47_vm2, %vm48_vm1 }
  0x97   :  { %v44_v9 = vsub.f32 1.0, %v43_v8 }
  0x99   :  { %v45_v11 = vmul.f32 %v95_v7, %v44_v9 }
  0x9b   :  { %v46_v13 = vadd.f32 %v95_v7, %v45_v11 }
  0x9d   :  { %v50_v15 = vsel %vm49_vm3, %v95_v7, %v46_v13 }
  0x9e   :  { %v55_v16 = vsel %vm52_vm4, %v54_v14, %v50_v15 }
  0x9f   :  { %v57_v17 = vmul.f32 1.442695, %v55_v16 }
  0xa1   :  { %96 = vpow2.f32 %v57_v17 }
  0xa7   :  { %v97_v18 = vpop.eup %96 }
  0xa8   :  { %v59_v19 = vrot.slane %v97_v18, 4 }
  0xaa   :  { %v60_v20 = vadd.f32 %v97_v18, %v59_v19 }
  0xac   :  { %v61_v21 = vrot.slane %v60_v20, 2 }
  0xae   :  { %v62_v22 = vadd.f32 %v61_v21, %v60_v20 }
  0xb0   :  { %v63_v23 = vrot.slane %v62_v22, 1 }
  0xb2   :  { %v64_v24 = vadd.f32 %v63_v23, %v62_v22 }
  0xb4   :  { %v65_v25 = vmul.f32 0.5, %v64_v24 }
  0xb6   :  { %98 = vrcp.f32 %v65_v25  ;;  %v77_v30 = vand.u32 2147483648, %v65_v25  ;;  %v75_v32 = vand.u32 2147483647, %v65_v25  ;;  %vm71_vm6 = vweird.f32 %v65_v25 }
  0xb8   :  { %v78_v35 = vor.u32 1.1754944e-38, %v77_v30  ;;  %vm76_vm8 = vcmp.eq.f32.partialorder %v75_v32, 8.507059e+37 }
  0xbc   :  { %v99_v26 = vpop.eup %98 }
  0xbd   :  { %v67_v27 = vmul.f32 %v99_v26, %v65_v25  ;;  %vm72_vm5 = vweird.f32 %v99_v26 }
  0xbe   :  { %vm73_vm7 = vmor %vm71_vm6, %vm72_vm5 }
  0xbf   :  { %v68_v29 = vsub.f32 1.0, %v67_v27 }
  0xc1   :  { %v69_v31 = vmul.f32 %v99_v26, %v68_v29 }
  0xc3   :  { %v70_v34 = vadd.f32 %v99_v26, %v69_v31 }
  0xc5   :  { %v74_v36 = vsel %vm73_vm7, %v99_v26, %v70_v34 }
  0xc6   :  { %v79_v37 = vsel %vm76_vm8, %v78_v35, %v74_v36 }
  0xc7   :  { %v80_v38 = vmul.f32 %v97_v18, %v79_v37 }
  0xc9   :  { %v84_v39 = vsel %vm83_vm9, %v80_v38, %v55_v16 }
  0xca   :  { %85 = vst [vmem:[%s129_s2] sm:$0xff] %v84_v39 }

</bundles_post_ra>
